<compile_context>
chip_gen: v7x
topology: tpu7x:2x2x1
jax: 0.10.0
libtpu: 0.0.40
codegen_flags: <defaults>
</compile_context>

<pallas_src>
import functools

import jax
import jax.numpy as jnp
from jax.experimental import pallas as pl
from jax.experimental.pallas import tpu as pltpu

LANES = 128


def _cdiv(a, b):
    return -(-a // b)


def _round_up(a, b):
    return _cdiv(a, b) * b


def _loss_kernel(true_ref, pred_ref, out_ref, *, beta, total, block_rows,
                 blocks_per_core):
    c = pl.program_id(0)   # parallel axis (TensorCore split on v7x)
    k = pl.program_id(1)   # arbitrary (sequential reduction) axis

    @pl.when(k == 0)
    def _():
        out_ref[...] = jnp.zeros_like(out_ref)

    t = true_ref[...].astype(jnp.float32)
    p = pred_ref[...].astype(jnp.float32)
    be = jnp.float32(beta) * jnp.abs(t - p)
    # Literal formula from the PyTorch module.
    # TODO(synk): jnp.log(-jnp.expm1(-be)) is the numerically robust variant
    # for tiny errors (same EUP op count) if parity with a clamped/robust
    # reference is ever desired.
    val = be - jnp.log(1.0 - jnp.exp(-be))

    # Mask out wrapper tail padding so it contributes 0 to the sum.
    # (int32 element indices: fine for tensors < 2^31 elements.)
    base_row = (c * blocks_per_core + k) * block_rows
    row_ids = jax.lax.broadcasted_iota(jnp.int32, (block_rows, LANES), 0)
    lane_ids = jax.lax.broadcasted_iota(jnp.int32, (block_rows, LANES), 1)
    idx = (base_row + row_ids) * LANES + lane_ids
    val = jnp.where(idx < total, val, 0.0)

    # Sublane-group partial sums only (pure VALU, no cross-lane XLU reduce);
    # the final 128-lane reduce happens once, outside the kernel.
    out_ref[...] += val.reshape(block_rows // 8, 8, LANES).sum(axis=0)


def contrastive_diffusion_loss(true, pred, beta, *, target_block_rows=1024,
                               ncores=2):
    assert true.shape == pred.shape
    total = int(true.size)
    assert total < 2**31 - LANES * 2048, "int32 element indexing in kernel"

    rows = _cdiv(total, LANES)
    # Multiple of 16 sublanes keeps the block legal for f32 and bf16 inputs.
    block_rows = min(int(target_block_rows), _round_up(_cdiv(rows, ncores), 16))
    blocks_per_core = _cdiv(rows, ncores * block_rows)
    padded_rows = ncores * blocks_per_core * block_rows
    padded_total = padded_rows * LANES

    t_flat = true.reshape(-1)
    p_flat = pred.reshape(-1)
    if padded_total != total:
        # Pad values give a finite per-element term (err = 1); padded elements
        # are masked out inside the kernel anyway.
        t_flat = jnp.pad(t_flat, (0, padded_total - total), constant_values=0)
        p_flat = jnp.pad(p_flat, (0, padded_total - total), constant_values=1)
    t2 = t_flat.reshape(padded_rows, LANES)
    p2 = p_flat.reshape(padded_rows, LANES)

    kernel = functools.partial(
        _loss_kernel, beta=float(beta), total=total,
        block_rows=block_rows, blocks_per_core=blocks_per_core)

    partials = pl.pallas_call(
        kernel,
        out_shape=jax.ShapeDtypeStruct((ncores * 8, LANES), jnp.float32),
        grid_spec=pltpu.PrefetchScalarGridSpec(
            num_scalar_prefetch=0,
            grid=(ncores, blocks_per_core),
            in_specs=[
                pl.BlockSpec((block_rows, LANES),
                             lambda c, k: (c * blocks_per_core + k, 0)),
                pl.BlockSpec((block_rows, LANES),
                             lambda c, k: (c * blocks_per_core + k, 0)),
            ],
            out_specs=pl.BlockSpec((8, LANES), lambda c, k: (c, 0)),
        ),
        compiler_params=pltpu.CompilerParams(
            dimension_semantics=("parallel", "arbitrary")),
    )(t2, p2)

    # Single cheap cross-lane reduce over (ncores*8, 128) partials.
    return jnp.sum(partials) / jnp.float32(total)


def _reference(true, pred, beta):
    err = jnp.abs(true - pred)
    return jnp.mean(beta * err - jnp.log(1.0 - jnp.exp(-beta * err)))


if __name__ == "__main__":
    key = jax.random.PRNGKey(0)
    k1, k2, k3, k4 = jax.random.split(key, 4)
    beta = 1.5

    # Primary NCHW diffusion-style input.
    shape = (2, 4, 16, 16)
    true = jax.random.normal(k1, shape, dtype=jnp.float32)
    pred = jax.random.normal(k2, shape, dtype=jnp.float32)
    loss = contrastive_diffusion_loss(true, pred, beta)
    jax.block_until_ready(loss)
    ref = _reference(true, pred, beta)
    assert jnp.allclose(loss, ref, rtol=1e-5, atol=1e-5), (loss, ref)

    # Odd-sized case exercising the tail-padding / in-kernel masking path.
    shape2 = (2, 3, 17, 19)
    t_odd = jax.random.normal(k3, shape2, dtype=jnp.float32)
    p_odd = jax.random.normal(k4, shape2, dtype=jnp.float32)
    loss2 = contrastive_diffusion_loss(t_odd, p_odd, beta)
    jax.block_until_ready(loss2)
    ref2 = _reference(t_odd, p_odd, beta)
    assert jnp.allclose(loss2, ref2, rtol=1e-5, atol=1e-5), (loss2, ref2)

    print("KERNEL_OK")
</pallas_src>

<mosaic_0001>
module attributes {stable_mosaic.version = 11 : i64} {
  func.func @_loss_kernel(%arg0: i32, %arg1: i32, %arg2: memref<16x128xf32, #tpu.memory_space<vmem>>, %arg3: memref<16x128xf32, #tpu.memory_space<vmem>>, %arg4: memref<8x128xf32, #tpu.memory_space<vmem>>) attributes {dimension_semantics = [#tpu.dimension_semantics<parallel>, #tpu.dimension_semantics<arbitrary>], iteration_bounds = array<i64: 2, 1>, scalar_prefetch = 0 : i64, scratch_operands = 0 : i64, tpu.core_type = #tpu.core_type<tc>, window_params = [{transform_indices = @transform_0, window_bounds = array<i64: 16, 128>}, {transform_indices = @transform_1, window_bounds = array<i64: 16, 128>}, {transform_indices = @transform_2, window_bounds = array<i64: 8, 128>}]} {
    %c0_i32 = arith.constant 0 : i32
    %0 = arith.cmpi eq, %arg1, %c0_i32 : i32
    %1 = arith.extui %0 : i1 to i32
    %c0_i32_0 = arith.constant 0 : i32
    %2 = arith.cmpi ne, %1, %c0_i32_0 : i32
    scf.if %2 {
      %cst_12 = arith.constant 0.000000e+00 : f32
      %35 = vector.broadcast %cst_12 : f32 to vector<8x128xf32>
      %c0_13 = arith.constant 0 : index
      %c0_14 = arith.constant 0 : index
      %36 = vector.load %arg4[%c0_13, %c0_14] : memref<8x128xf32, #tpu.memory_space<vmem>>, vector<8x128xf32>
      tpu.vector_store %arg4[%c0_13, %c0_14], %35 {strides = array<i32>} : memref<8x128xf32, #tpu.memory_space<vmem>>, vector<8x128xf32>,
    } else {
    }
    %c0 = arith.constant 0 : index
    %c0_1 = arith.constant 0 : index
    %3 = vector.load %arg2[%c0, %c0_1] : memref<16x128xf32, #tpu.memory_space<vmem>>, vector<16x128xf32>
    %c0_2 = arith.constant 0 : index
    %c0_3 = arith.constant 0 : index
    %4 = vector.load %arg3[%c0_2, %c0_3] : memref<16x128xf32, #tpu.memory_space<vmem>>, vector<16x128xf32>
    %5 = arith.subf %3, %4 : vector<16x128xf32>
    %6 = math.absf %5 : vector<16x128xf32>
    %cst = arith.constant 1.500000e+00 : f32
    %7 = vector.broadcast %cst : f32 to vector<16x128xf32>
    %8 = arith.mulf %7, %6 : vector<16x128xf32>
    %cst_4 = arith.constant 0.000000e+00 : f32
    %9 = vector.broadcast %cst_4 : f32 to vector<16x128xf32>
    %10 = arith.subf %9, %8 : vector<16x128xf32>
    %11 = math.exp %10 : vector<16x128xf32>
    %cst_5 = arith.constant 1.000000e+00 : f32
    %12 = vector.broadcast %cst_5 : f32 to vector<16x128xf32>
    %13 = arith.subf %12, %11 : vector<16x128xf32>
    %14 = math.log %13 : vector<16x128xf32>
    %15 = arith.subf %8, %14 : vector<16x128xf32>
    %c1_i32 = arith.constant 1 : i32
    %16 = arith.muli %arg0, %c1_i32 : i32
    %17 = arith.addi %16, %arg1 : i32
    %c16_i32 = arith.constant 16 : i32
    %18 = arith.muli %17, %c16_i32 : i32
    %19 = tpu.iota {dimensions = array<i32: 0>} : vector<16x128xi32>
    %20 = tpu.iota {dimensions = array<i32: 1>} : vector<16x128xi32>
    %21 = vector.broadcast %18 : i32 to vector<16x128xi32>
    %22 = arith.addi %21, %19 : vector<16x128xi32>
    %c128_i32 = arith.constant 128 : i32
    %23 = vector.broadcast %c128_i32 : i32 to vector<16x128xi32>
    %24 = arith.muli %22, %23 : vector<16x128xi32>
    %25 = arith.addi %24, %20 : vector<16x128xi32>
    %c2048_i32 = arith.constant 2048 : i32
    %26 = vector.broadcast %c2048_i32 : i32 to vector<16x128xi32>
    %27 = arith.cmpi slt, %25, %26 : vector<16x128xi32>
    %cst_6 = arith.constant 0.000000e+00 : f32
    %28 = vector.broadcast %cst_6 : f32 to vector<16x128xf32>
    %29 = arith.select %27, %15, %28 : vector<16x128xi1>, vector<16x128xf32>
    %c0_7 = arith.constant 0 : index
    %c0_8 = arith.constant 0 : index
    %30 = vector.load %arg4[%c0_7, %c0_8] : memref<8x128xf32, #tpu.memory_space<vmem>>, vector<8x128xf32>
    %31 = vector.shape_cast %29 : vector<16x128xf32> to vector<2x8x128xf32>
    %cst_9 = arith.constant dense<0.000000e+00> : vector<8x128xf32>
    %32 = vector.multi_reduction <add>, %31, %cst_9 [0] : vector<2x8x128xf32> to vector<8x128xf32>
    %33 = arith.addf %30, %32 : vector<8x128xf32>
    %c0_10 = arith.constant 0 : index
    %c0_11 = arith.constant 0 : index
    %34 = vector.load %arg4[%c0_10, %c0_11] : memref<8x128xf32, #tpu.memory_space<vmem>>, vector<8x128xf32>
    tpu.vector_store %arg4[%c0_10, %c0_11], %33 {strides = array<i32>} : memref<8x128xf32, #tpu.memory_space<vmem>>, vector<8x128xf32>,
    return
  }
  func.func @transform_0(%arg0: i32, %arg1: i32) -> (i32, i32) {
    %c1_i32 = arith.constant 1 : i32
    %0 = arith.muli %arg0, %c1_i32 : i32
    %1 = arith.addi %0, %arg1 : i32
    %c0_i32 = arith.constant 0 : i32
    %c0_i32_0 = arith.constant 0 : i32
    return %1, %c0_i32 : i32, i32
  }
  func.func @transform_1(%arg0: i32, %arg1: i32) -> (i32, i32) {
    %c1_i32 = arith.constant 1 : i32
    %0 = arith.muli %arg0, %c1_i32 : i32
    %1 = arith.addi %0, %arg1 : i32
    %c0_i32 = arith.constant 0 : i32
    %c0_i32_0 = arith.constant 0 : i32
    return %1, %c0_i32 : i32, i32
  }
  func.func @transform_2(%arg0: i32, %arg1: i32) -> (i32, i32) {
    %c0_i32 = arith.constant 0 : i32
    %c0_i32_0 = arith.constant 0 : i32
    return %arg0, %c0_i32 : i32, i32
  }
}

</mosaic_0001>

<bundles_post_ra>
// kernel: tpu_custom_call.1
= control target key start
LH: loop header
LB: loop body
LE: loop exit
PB: predicated region body
PF: predicated region fallthrough
CT: control target
= control target key end

     0   :  { %7 = vsyncpa [#allocation3], 0  ;;  %s895_s0 = inlined_call_operand.hbm [shape: f32[32,128], index: 0, kind: input, shape index: {}]   ;;  %s896_s1 = inlined_call_operand.hbm [shape: f32[32,128], index: 1, kind: input, shape index: {}]   ;;  %s897_s2 = inlined_call_operand.hbm [shape: f32[16,128], index: 2, kind: output, shape index: {}]  }
   0x1   :  { %9 = vsyncpa [#allocation3 + $0x1], 0 }
   0x2   :  { %10 = vsyncpa [#allocation6], 0 }
   0x3   :  { %12 = vsyncpa [#allocation6 + $0x1], 0 }
   0x4   :  { %13 = vsyncpa [#allocation4], 0 }
   0x5   :  { %15 = vsyncpa [#allocation4 + $0x1], 0  ;;  %s659_s9 = smov 0   ;;  %s661_s10 = smov 0  }
   0x6   :  { %s663_s11 = smov 0   ;;  %s665_s12 = smov 0  }
   0x7   :  { %s667_s13 = smov 0   ;;  %s669_s14 = smov 0  }
   0x8 LB: > { %s392_s15 = sadd.s32 4294967295, %s637_s14   ;;  %s393_s16 = sadd.s32 4294967294, %s637_s14   ;;  %s637_s14 = sphi %s669_s14, %s21_s14   ;;  %s633_s13 = sphi %s667_s13, %s915_s13   ;;  %s629_s12 = sphi %s665_s12, %s914_s12   ;;  %s625_s11 = sphi %s663_s11, %s913_s11   ;;  %s621_s10 = sphi %s661_s10, %s912_s10   ;;  %s617_s9 = sphi %s659_s9, %s911_s9  }
   0x9   : > { %s33_s17 = sadd.s32 1, %s633_s13  ;;  %s42_s18 = sadd.s32 1, %s625_s11 }
   0xa   : > { %p35_p0 = scmp.ge.s32.totalorder %s33_s17, 2  ;;  %p49_p1 = scmp.ne.s32.totalorder %s625_s11, %s621_s10 }
   0xb   : > { %p50_p2 = scmp.eq.s32.totalorder %s637_s14, 0  ;;  %p55_p3 = scmp.ne.s32.totalorder %s621_s10, %s617_s9 }
   0xc   : > { %s917_s17 = smov (%p35_p0, %s33_s17), 0  ;;  %p56_p5 = scmp.eq.s32.totalorder %s392_s15, 0 }
   0xd   : > { %p700_p4 = por %p50_p2, %p49_p1  ;;  %s39_s20 = ssub.s32 %s633_s13, %s917_s17 }
   0xe   : > { %p107_p6 = scmp.eq.s32.totalorder %s392_s15, 1  ;;  %p40_p7 = scmp.eq.s32.totalorder %s39_s20, 0 }
   0xf   : > { %p706_p8 = por %p56_p5, %p55_p3  ;;  %p113_p10 = scmp.eq.s32.totalorder %s393_s16, 1 }
  0x10   : > { %p710_p9 = por %p107_p6, %p49_p1  ;;  %p430_p13 = scmp.lt.s32.totalorder %s637_s14, 2 }
  0x11   : > { %s901_s21 = scalar_select %p706_p8, 1, 0 }
  0x12   : > { %s902_s22 = scalar_select %p710_p9, 1, 0 }
  0x13   : > { %s715_s23 = scalar_select %p40_p7, %s625_s11, %s42_s18  }
  0x14   : > { %p717_p11 = por %p113_p10, %p55_p3  ;;  %s724_s25 = sand.u32 1, %s625_s11  }
  0x15   : > { %s396_s26 = sshll.u32 %s724_s25, 4  ;;  %s411_s27 = sshll.u32 %s633_s13, 8 }
  0x16   : > { %s903_s24 = scalar_select %p717_p11, 1, 0 }
  0x17   : > { %s733_s30 = scalar_lea.hbm %s895_s0, %s411_s27  ;;  %s137_s3 = scalar_lea.vmem [#allocation2], %s396_s26 }
  0x18   : > { %s145_s4 = sshll.u32 %s137_s3, 4  ;;  %p741_p0 = pnand %p430_p13, %p700_p4  ;;  %s737_s4 = int_to_ptr.vmem [resolvable:$true] %s145_s4 }
  0x19   : > { %s134_s6 = scalar_lea.sflag [#allocation3], %s724_s25  ;;  %s491_s7 = scalar_lea.hbm %s733_s30, 256 }
  0x1a   : > { %p492_p2 = scmp.ne.s32.totalorder %s733_s30, %s491_s7  ;;  %p493_p3 = pneg %p741_p0 }
  0x1b   : > { %s496_s16 = scalar_lea.hbm %s895_s0, 512  ;;  %p497_p4 = scmp.lt.u32.totalorder %s733_s30, %s895_s0 }
  0x1c   : > { %p494_p5 = pnand %p493_p3, %p492_p2  ;;  %p498_p7 = scmp.lt.u32.totalorder %s496_s16, %s491_s7 }
  0x1d   : > { %p500_p13 = scmp.lt.u32.totalorder %s491_s7, %s733_s30 }
  0x1e   : > { %p495_p6 = pneg %p494_p5  ;;  %p499_p10 = por %p498_p7, %p497_p4 }
  0x20   : > { %p501_p12 = por %p500_p13, %p499_p10 }
  0x22   : > { %p502_p1 = pnand %p501_p12, %p495_p6 }
  0x24   : > { %505 = shalt.err (!%p502_p1)
}
  0x25   : > { %s506_s20 = scalar_lea.vmem %s737_s4, 256  ;;  %s639_s28 = smov [#allocation2]  }
  0x26   : > { %p507_p2 = scmp.ne.s32.totalorder %s737_s4, %s506_s20  ;;  %s511_s29 = sshll.u32 %s639_s28, 4  ;;  %s512_s29 = int_to_ptr.vmem [resolvable:$false] %s511_s29 }
  0x27   : > { %s513_s3 = scalar_lea.vmem %s512_s29, 512  ;;  %p514_p9 = scmp.lt.s32.totalorder %s737_s4, %s512_s29 }
  0x28   : > { %p509_p5 = pnand %p507_p2, %p493_p3  ;;  %p515_p4 = scmp.lt.s32.totalorder %s513_s3, %s506_s20 }
  0x2a   : > { %p510_p11 = pneg %p509_p5  ;;  %p516_p7 = por %p515_p4, %p514_p9 }
  0x2c   : > { %p517_p10 = pnand %p516_p7, %p510_p11 }
  0x2e   : > { %520 = shalt.err (!%p517_p10)
}
  0x2f   : > { %s640_s7 = smov 128   ;;  %s641_s8 = smov 8  }
  0x30   : > { %422 = dma.hbm_to_vmem [thread:$0]  (!%p741_p0), %s733_s30, 256, %s737_s4, %s134_s6, %s640_s7, %s640_s7, %s641_s8  }
  0x31   : > { %p175_p9 = scmp.lt.s32.totalorder %s637_s14, 3  ;;  %s783_s18 = scalar_lea.hbm %s896_s1, %s411_s27 }
  0x32   : > { %p905_p11 = scmp.ge.s32.totalorder %s637_s14, 1  ;;  %s159_s20 = scalar_lea.vmem [#allocation5], %s396_s26 }
  0x33   : > { %s167_s28 = sshll.u32 %s159_s20, 4  ;;  %s156_s30 = scalar_lea.sflag [#allocation6], %s724_s25  ;;  %s793_s28 = int_to_ptr.vmem [resolvable:$true] %s167_s28 }
  0x34   : > { %p787_p12 = pnand %p905_p11, %p175_p9  ;;  %s521_s4 = scalar_lea.hbm %s783_s18, 256 }
  0x35   : > { %p522_p1 = scmp.ne.s32.totalorder %s783_s18, %s521_s4  ;;  %s526_s29 = scalar_lea.hbm %s896_s1, 512 }
  0x36   : > { %p527_p2 = scmp.lt.u32.totalorder %s783_s18, %s896_s1  ;;  %p528_p5 = scmp.lt.u32.totalorder %s526_s29, %s521_s4 }
  0x37   : > { %p524_p6 = pnand %p522_p1, %p493_p3  ;;  %p530_p7 = scmp.lt.u32.totalorder %s521_s4, %s783_s18 }
  0x38   : > { %p529_p4 = por %p528_p5, %p527_p2 }
  0x39   : > { %p525_p13 = pneg %p524_p6 }
  0x3a   : > { %p531_p10 = por %p530_p7, %p529_p4 }
  0x3c   : > { %p532_p9 = pnand %p531_p10, %p525_p13 }
  0x3e   : > { %535 = shalt.err (!%p532_p9)
}
  0x3f   : > { %s536_s26 = scalar_lea.vmem %s793_s28, 256  ;;  %s642_s16 = smov [#allocation5]  }
  0x40   : > { %p537_p11 = scmp.ne.s32.totalorder %s793_s28, %s536_s26  ;;  %s541_s20 = sshll.u32 %s642_s16, 4  ;;  %s542_s20 = int_to_ptr.vmem [resolvable:$false] %s541_s20 }
  0x41   : > { %s543_s27 = scalar_lea.vmem %s542_s20, 512  ;;  %p544_p8 = scmp.lt.s32.totalorder %s793_s28, %s542_s20 }
  0x42   : > { %p539_p1 = pnand %p537_p11, %p493_p3  ;;  %p545_p2 = scmp.lt.s32.totalorder %s543_s27, %s536_s26 }
  0x44   : > { %p540_p6 = pneg %p539_p1  ;;  %p546_p5 = por %p545_p2, %p544_p8 }
  0x46   : > { %p547_p4 = pnand %p546_p5, %p540_p6 }
  0x48   : > { %550 = shalt.err (!%p547_p4)
}
  0x49   : > { %425 = dma.hbm_to_vmem [thread:$0]  (!%p741_p0), %s783_s18, 256, %s793_s28, %s156_s30, %s640_s7, %s640_s7, %s641_s8  }
  0x4a   : > { %179 = sbr.rel (%p787_p12) target bundleno = 142 (0x8e), region = 28  ;;  %s827_s4 = sand.u32 (!%p787_p12), 1, %s621_s10  }
  0x4b   : > { %s403_s6 = sshll.u32 (!%p787_p12), %s827_s4, 4  ;;  %s182_s29 = scalar_lea.sflag (!%p787_p12), [#allocation3], %s827_s4 }
  0x4c   : > { %s185_s5 = scalar_lea.vmem (!%p787_p12), [#allocation2], %s403_s6  ;;  %p907_p8 = scmp.ne.s32.totalorder (!%p787_p12), %s901_s21, 0 }
  0x51   : > { %604 = dma.done.wait (%p907_p8), %s182_s29, 256  }
  0x52   : > { %606 = vsyncadd (%p907_p8), %s182_s29, 4294967040  ;;  %s191_s25 = scalar_lea.sflag [#allocation6], %s827_s4  ;;  %s194_s7 = scalar_lea.vmem [#allocation5], %s403_s6 }
  0x53   : > { %608 = dma.done.wait (%p907_p8), %s191_s25, 256  }
  0x54   : > { %610 = vsyncadd (%p907_p8), %s191_s25, 4294967040  ;;  %v229_v0 = vld [vmem:[%s185_s5] sm:$0xff]  ;;  %v230_v1 = vld [vmem:[%s185_s5 + $0x8] sm:$0xff]  ;;  %v255_v14 = vlaneseq  ;;  %s406_s21 = sshll.u32 %s629_s12, 4  ;;  %s405_s8 = sshll.u32 %s827_s4, 3 }
  0x55   : > { %v231_v2 = vld [vmem:[%s194_s7] sm:$0xff]  ;;  %v232_v3 = vld [vmem:[%s194_s7 + $0x8] sm:$0xff]  ;;  %v260_v18 = vstv %s406_s21  ;;  %s408_s18 = sshll.u32 %s629_s12, 7  ;;  %s219_s19 = scalar_lea.vmem [#allocation7], %s405_s8 }
  0x56   : > { %v233_v4 = vsub.f32 %v229_v0, %v231_v2  ;;  %v234_v5 = vsub.f32 %v230_v1, %v232_v3  ;;  %v256_v15 = vshrl.u32 %v255_v14, 7  ;;  %v259_v24 = vand.u32 127, %v255_v14  ;;  %s289_s28 = sshll.u32 %s219_s19, 4  ;;  %s846_s15 = scalar_lea.hbm %s897_s2, %s408_s18  ;;  %s848_s28 = int_to_ptr.vmem [resolvable:$true] %s289_s28 }
  0x57   : > { %s276_s26 = scalar_lea.sflag [#allocation4], %s827_s4  ;;  %s551_s16 = scalar_lea.vmem %s848_s28, 128 }
  0x58   : > { %v235_v6 = vand.u32 2147483647, %v233_v4  ;;  %v236_v7 = vand.u32 2147483647, %v234_v5  ;;  %v257_v17 = vadd.s32 8, %v256_v15  ;;  %v261_v22 = vadd.s32 %v260_v18, %v256_v15  ;;  %p552_p0 = scmp.ne.s32.totalorder %s848_s28, %s551_s16  ;;  %p908_p3 = scmp.ne.s32.totalorder %s902_s22, 0 }
  0x59   : > { %s643_s12 = smov [#allocation7]  }
  0x5a   : > { %v237_v8 = vmul.f32 1.5, %v235_v6  ;;  %v238_v9 = vmul.f32 1.5, %v236_v7  ;;  %v262_v23 = vadd.s32 %v260_v18, %v257_v17  ;;  %v263_v25 = vmul.u32 128, %v261_v22  ;;  %p553_p12 = pnand %p552_p0, %p908_p3  ;;  %s555_s20 = sshll.u32 %s643_s12, 4  ;;  %s556_s20 = int_to_ptr.vmem [resolvable:$false] %s555_s20 }
  0x5b   : > { %s557_s27 = scalar_lea.vmem %s556_s20, 256  ;;  %p558_p7 = scmp.lt.s32.totalorder %s848_s28, %s556_s20 }
  0x5c   : > { %v239_v10 = vsub.f32 0.0, %v237_v8  ;;  %v240_v11 = vsub.f32 0.0, %v238_v9  ;;  %v264_v26 = vmul.u32 128, %v262_v23  ;;  %v265_v27 = vadd.s32 %v263_v25, %v259_v24  ;;  %p554_p13 = pneg %p553_p12  ;;  %p559_p10 = scmp.lt.s32.totalorder %s557_s27, %s551_s16 }
  0x5e   : > { %v241_v12 = vmul.f32 1.442695, %v239_v10  ;;  %v243_v13 = vmul.f32 1.442695, %v240_v11  ;;  %v266_v28 = vadd.s32 %v264_v26, %v259_v24  ;;  %vm267_vm0 = vcmp.lt.s32.totalorder %v265_v27, 2048  ;;  %p560_p9 = por %p559_p10, %p558_p7 }
  0x60   : > { %483 = vpow2.f32 %v241_v12  ;;  %vm268_vm1 = vcmp.lt.s32.totalorder %v266_v28, 2048  ;;  %p561_p11 = pnand %p560_p9, %p554_p13 }
  0x61   : > { %485 = vpow2.f32 %v243_v13 }
  0x6a   : > { %v484_v16 = vpop.eup %483 }
  0x6b   : > { %v486_v19 = vpop.eup %485  ;;  %v245_v20 = vsub.f32 1.0, %v484_v16 }
  0x6c   : > { %v246_v21 = vsub.f32 1.0, %v486_v19 }
  0x6d   : > { %487 = vlog2.f32 %v245_v20 }
  0x6e   : > { %489 = vlog2.f32 %v246_v21 }
  0x77   : > { %v488_v29 = vpop.eup %487 }
  0x78   : > { %v490_v30 = vpop.eup %489  ;;  %v248_v31 = vmul.f32 0.6931472, %v488_v29 }
  0x79   : > { %v250_v32 = vmul.f32 0.6931472, %v490_v30 }
  0x7a   : > { %v251_v33 = vsub.f32 %v237_v8, %v248_v31 }
  0x7b   : > { %v252_v34 = vsub.f32 %v238_v9, %v250_v32 }
  0x7c   : > { %v269_v35 = vsel %vm267_vm0, %v251_v33, 0.0 }
  0x7d   : > { %v270_v36 = vsel %vm268_vm1, %v252_v34, 0.0 }
  0x7e   : > { %v272_v37 = vadd.f32 %v270_v36, %v269_v35 }
  0x80   : > { %274 = vst [vmem:[%s219_s19] sm:$0xff] %v272_v37 }
  0x81   : > { %564 = shalt.err (!%p561_p11)
}
  0x82   : > { %s565_s4 = scalar_lea.hbm %s846_s15, 128  ;;  %s569_s5 = scalar_lea.hbm %s897_s2, 256 }
  0x83   : > { %p566_p1 = scmp.ne.s32.totalorder %s846_s15, %s565_s4  ;;  %p570_p5 = scmp.lt.u32.totalorder %s846_s15, %s897_s2 }
  0x84   : > { %p571_p4 = scmp.lt.u32.totalorder %s569_s5, %s565_s4  ;;  %p573_p0 = scmp.lt.u32.totalorder %s565_s4, %s846_s15 }
  0x85   : > { %p567_p6 = pnand %p566_p1, %p908_p3 }
  0x86   : > { %p572_p8 = por %p571_p4, %p570_p5 }
  0x87   : > { %p568_p2 = pneg %p567_p6 }
  0x88   : > { %p574_p12 = por %p573_p0, %p572_p8 }
  0x8a   : > { %p575_p13 = pnand %p574_p12, %p568_p2 }
  0x8c   : > { %578 = shalt.err (!%p575_p13)
}
  0x8d   : > { %417 = dma.vmem_to_hbm [thread:$0]  (%p908_p3), %s848_s28, 128, %s846_s15, %s276_s26  }
  0x8e PF: > { %s301_s21 = sand.u32 1, %s617_s9   ;;  %p909_p7 = scmp.ne.s32.totalorder %s903_s24, 0 }
  0x8f   : > { %p910_p10 = scmp.ge.s32.totalorder %s637_s14, 2  ;;  %s302_s8 = scalar_lea.sflag [#allocation4], %s301_s21 }
  0x91   : > { %p427_p9 = pnand %p910_p10, %p909_p7 }
  0x93   : > { %612 = dma.done.wait (!%p427_p9), %s302_s8, 128  }
  0x94   : > { %614 = vsyncadd (!%p427_p9), %s302_s8, 4294967168  ;;  %s21_s14 = sadd.s32 1, %s637_s14   ;;  %s911_s9 = smov %s621_s10 }
  0x95   : > { %p18_p11 = scmp.ge.s32.totalorder %s21_s14, 4   ;;  %s912_s10 = smov %s625_s11 }
  0x96   : > { %s913_s11 = smov %s715_s23  ;;  %s914_s12 = smov %s633_s13 }
  0x97   : > { %s915_s13 = smov %s917_s17  ;;  %20 = sbr.rel (!%p18_p11) target bundleno = 8 (0x8), region = 90 }
  0x9e   :  { %307 = vsyncpa [#allocation3], 1 }
  0x9f   :  { %309 = vsyncpa [#allocation3 + $0x1], 1 }
  0xa0   :  { %310 = vsyncpa [#allocation6], 1 }
  0xa1   :  { %312 = vsyncpa [#allocation6 + $0x1], 1 }
  0xa2   :  { %313 = vsyncpa [#allocation4], 1 }
  0xa3   :  { %315 = vsyncpa [#allocation4 + $0x1], 1 }

</bundles_post_ra>
